<compile_context>
chip_gen: v5e
topology: v5e:2x2
jax: 0.10.0
libtpu: 0.0.40
codegen_flags: <defaults>
</compile_context>

<pallas_src>
import functools

import jax
import jax.numpy as jnp
from jax.experimental import pallas as pl
from jax.experimental.pallas import tpu as pltpu

_LANES = 128


def _sigma_entries(w, h, r):
    """(S,128) w/h/r -> symmetric 2x2 covariance entries s11, s12, s22."""
    w = jnp.clip(w, 1e-7, 1e7)
    h = jnp.clip(h, 1e-7, 1e7)
    cos_r = jnp.cos(r)
    sin_r = jnp.sin(r)
    a = (0.5 * w) ** 2  # (w/2)^2
    b = (0.5 * h) ** 2  # (h/2)^2
    # Sigma = R @ diag(a, b) @ R^T
    s11 = cos_r * cos_r * a + sin_r * sin_r * b
    s12 = cos_r * sin_r * (a - b)
    s22 = sin_r * sin_r * a + cos_r * cos_r * b
    return s11, s12, s22


def kfiou_kernel(pred_ref, targ_ref, out_ref, *, beta, eps, fun):
    # pred_ref / targ_ref: (5, S, 128); out_ref: (2, S, 128)
    p = pred_ref[...]
    t = targ_ref[...]

    xp, yp = p[0], p[1]
    xt, yt = t[0], t[1]
    p11, p12, p22 = _sigma_entries(p[2], p[3], p[4])
    t11, t12, t22 = _sigma_entries(t[2], t[3], t[4])

    # Smooth-L1 on the centers, summed over (x, y). (beta is a compile-time const.)
    half_inv_beta = 0.5 / beta
    half_beta = 0.5 * beta

    def smooth_l1(d):
        return jnp.where(d < beta, d * d * half_inv_beta, d - half_beta)

    xy_loss = smooth_l1(jnp.abs(xp - xt)) + smooth_l1(jnp.abs(yp - yt))

    # Volumes of pred / target Gaussians.
    det_p = p11 * p22 - p12 * p12
    det_t = t11 * t22 - t12 * t12
    vb_p = 4.0 * jnp.sqrt(jnp.maximum(det_p, 1e-7))
    vb_t = 4.0 * jnp.sqrt(jnp.maximum(det_t, 1e-7))

    # Sum = Sigma_p + Sigma_t ; analytic 2x2 inverse with a single reciprocal.
    s11 = p11 + t11
    s12 = p12 + t12
    s22 = p22 + t22
    det_s = s11 * s22 - s12 * s12
    inv_det = pl.reciprocal(det_s)          # one EUP reciprocal, three multiplies
    i11 = s22 * inv_det
    i12 = -s12 * inv_det
    i22 = s11 * inv_det

    # K = Sigma_p @ inv(Sum)
    k11 = p11 * i11 + p12 * i12
    k12 = p11 * i12 + p12 * i22
    k21 = p12 * i11 + p22 * i12
    k22 = p12 * i12 + p22 * i22

    # Sigma = Sigma_p - K @ Sigma_p  (symmetric: n21 == n12, so skip that path)
    n11 = p11 - (k11 * p11 + k12 * p12)
    n12 = p12 - (k11 * p12 + k12 * p22)
    n22 = p22 - (k21 * p12 + k22 * p22)
    det_n = n11 * n22 - n12 * n12

    vb = 4.0 * jnp.sqrt(jnp.maximum(det_n, 1e-7))
    vb = jnp.where(jnp.isnan(vb), jnp.zeros_like(vb), vb)

    kfiou = vb * pl.reciprocal(vb_p + vb_t - vb + eps)

    if fun == "ln":
        kf_loss = -jnp.log(kfiou + eps)
    elif fun == "exp":
        kf_loss = jnp.exp(1.0 - kfiou) - 1.0
    else:
        kf_loss = 1.0 - kfiou

    loss = jnp.maximum(0.01 * xy_loss + kf_loss, 1e-7)
    out_ref[0] = loss
    out_ref[1] = pl.reciprocal(1.0 + jnp.log1p(loss))


def kfiou_pallas(pred, target, *, fun="none", beta=1.0 / 9.0, eps=1e-6,
                 block_boxes=8192):
    """pred, target: (N, 5) xywhr boxes. Returns (loss, KFIoU), each (N,) f32."""
    assert pred.shape[0] == target.shape[0]
    assert pred.shape[-1] == 5 and target.shape[-1] == 5
    n = pred.shape[0]
    pred = pred.astype(jnp.float32)
    target = target.astype(jnp.float32)

    # Choose the sublane tile S (multiple of 8), boxes-per-step = S * 128.
    s_max = max(8, block_boxes // _LANES)
    n_blk_min = -(-n // _LANES)                         # ceil(n / 128)
    s = min(s_max, ((n_blk_min + 7) // 8) * 8)          # sublane tile
    n_blk = ((n_blk_min + s - 1) // s) * s              # pad to multiple of S
    n_pad = n_blk * _LANES

    def pack(x):
        # Single fused pad of the transposed boxes; no zeros+scatter pass.
        xt = jnp.pad(x.T, ((0, 0), (0, n_pad - n)))
        return xt.reshape(5, n_blk, _LANES)

    p = pack(pred)
    t = pack(target)

    kernel = functools.partial(kfiou_kernel, beta=beta, eps=eps, fun=fun)
    grid = (n_blk // s,)

    out = pl.pallas_call(
        kernel,
        out_shape=jax.ShapeDtypeStruct((2, n_blk, _LANES), jnp.float32),
        grid=grid,
        in_specs=[
            pl.BlockSpec((5, s, _LANES), lambda i: (0, i, 0)),
            pl.BlockSpec((5, s, _LANES), lambda i: (0, i, 0)),
        ],
        out_specs=pl.BlockSpec((2, s, _LANES), lambda i: (0, i, 0)),
        compiler_params=pltpu.CompilerParams(dimension_semantics=("parallel",)),
        cost_estimate=pl.CostEstimate(
            flops=100 * n_pad,
            transcendentals=12 * n_pad,
            bytes_accessed=48 * n_pad,
        ),
    )(p, t)

    flat = out.reshape(2, n_pad)
    return flat[0, :n], flat[1, :n]


def kfiou_reference(pred, target, *, fun="none", beta=1.0 / 9.0, eps=1e-6):
    """Pure-JAX reference mirroring the PyTorch module (for verification)."""
    pred = pred.astype(jnp.float32)
    target = target.astype(jnp.float32)

    def xy_wh_r_2_xy_sigma(xywhr):
        xy = xywhr[..., :2]
        wh = jnp.clip(xywhr[..., 2:4], 1e-7, 1e7)
        r = xywhr[..., 4]
        cos_r, sin_r = jnp.cos(r), jnp.sin(r)
        R = jnp.stack([cos_r, -sin_r, sin_r, cos_r], axis=-1).reshape(-1, 2, 2)
        S = 0.5 * jax.vmap(jnp.diag)(wh)
        sigma = R @ (S * S) @ jnp.swapaxes(R, -1, -2)
        return xy, sigma

    xy_p, Sp = xy_wh_r_2_xy_sigma(pred)
    xy_t, St = xy_wh_r_2_xy_sigma(target)
    diff = jnp.abs(xy_p - xy_t)
    xy_loss = jnp.where(diff < beta, 0.5 * diff * diff / beta, diff - 0.5 * beta).sum(-1)
    Vb_p = 4 * jnp.sqrt(jnp.maximum(jnp.linalg.det(Sp), 1e-7))
    Vb_t = 4 * jnp.sqrt(jnp.maximum(jnp.linalg.det(St), 1e-7))
    K = Sp @ jnp.linalg.inv(Sp + St)
    Sigma = Sp - K @ Sp
    Vb = 4 * jnp.sqrt(jnp.maximum(jnp.linalg.det(Sigma), 1e-7))
    Vb = jnp.where(jnp.isnan(Vb), 0.0, Vb)
    KFIoU = Vb / (Vb_p + Vb_t - Vb + eps)
    if fun == "ln":
        kf_loss = -jnp.log(KFIoU + eps)
    elif fun == "exp":
        kf_loss = jnp.exp(1 - KFIoU) - 1
    else:
        kf_loss = 1 - KFIoU
    loss = jnp.maximum(0.01 * xy_loss + kf_loss, 1e-7)
    return loss, 1.0 / (1.0 + jnp.log1p(loss))


def _make_boxes(key, n):
    kxy, kwh, kr = jax.random.split(key, 3)
    xy = jax.random.uniform(kxy, (n, 2), minval=0.0, maxval=16.0)
    wh = jax.random.uniform(kwh, (n, 2), minval=1.0, maxval=8.0)
    r = jax.random.uniform(kr, (n, 1), minval=-3.14, maxval=3.14)
    return jnp.concatenate([xy, wh, r], axis=-1).astype(jnp.float32)


if __name__ == "__main__":
    key = jax.random.PRNGKey(0)
    k1, k2, k3, k4 = jax.random.split(key, 4)

    # Test 1: small, ragged N (exercises lane/sublane padding), default tile.
    n1 = 300
    pred1, targ1 = _make_boxes(k1, n1), _make_boxes(k2, n1)
    loss1, iou1 = kfiou_pallas(pred1, targ1, fun="none")
    jax.block_until_ready((loss1, iou1))
    loss1_ref, iou1_ref = kfiou_reference(pred1, targ1, fun="none")
    assert jnp.allclose(loss1, loss1_ref, rtol=1e-3, atol=1e-5), "loss mismatch (N=300)"
    assert jnp.allclose(iou1, iou1_ref, rtol=1e-3, atol=1e-5), "KFIoU mismatch (N=300)"

    # Test 2: multi-block grid (3 steps of 1024 boxes), 'ln' branch.
    n2 = 2500
    pred2, targ2 = _make_boxes(k3, n2), _make_boxes(k4, n2)
    loss2, iou2 = kfiou_pallas(pred2, targ2, fun="ln", block_boxes=1024)
    jax.block_until_ready((loss2, iou2))
    loss2_ref, iou2_ref = kfiou_reference(pred2, targ2, fun="ln")
    assert jnp.allclose(loss2, loss2_ref, rtol=1e-3, atol=1e-5), "loss mismatch (N=2500)"
    assert jnp.allclose(iou2, iou2_ref, rtol=1e-3, atol=1e-5), "KFIoU mismatch (N=2500)"

    print("KERNEL_OK")
</pallas_src>

<mosaic_0001>
module attributes {stable_mosaic.version = 11 : i64} {
  func.func @kfiou_kernel(%arg0: i32, %arg1: memref<5x8x128xf32, #tpu.memory_space<vmem>>, %arg2: memref<5x8x128xf32, #tpu.memory_space<vmem>>, %arg3: memref<2x8x128xf32, #tpu.memory_space<vmem>>) attributes {dimension_semantics = [#tpu.dimension_semantics<parallel>], iteration_bounds = array<i64: 1>, scalar_prefetch = 0 : i64, scratch_operands = 0 : i64, tpu.core_type = #tpu.core_type<tc>, window_params = [{transform_indices = @transform_0, window_bounds = array<i64: 5, 8, 128>}, {transform_indices = @transform_1, window_bounds = array<i64: 5, 8, 128>}, {transform_indices = @transform_2, window_bounds = array<i64: 2, 8, 128>}]} {
    %c0 = arith.constant 0 : index
    %c0_0 = arith.constant 0 : index
    %c0_1 = arith.constant 0 : index
    %0 = vector.load %arg1[%c0, %c0_0, %c0_1] : memref<5x8x128xf32, #tpu.memory_space<vmem>>, vector<5x8x128xf32>
    %c0_2 = arith.constant 0 : index
    %c0_3 = arith.constant 0 : index
    %c0_4 = arith.constant 0 : index
    %1 = vector.load %arg2[%c0_2, %c0_3, %c0_4] : memref<5x8x128xf32, #tpu.memory_space<vmem>>, vector<5x8x128xf32>
    %2 = vector.extract_strided_slice %0 {offsets = [0, 0, 0], sizes = [1, 8, 128], strides = [1, 1, 1]} : vector<5x8x128xf32> to vector<1x8x128xf32>
    %3 = vector.shape_cast %2 : vector<1x8x128xf32> to vector<8x128xf32>
    %4 = vector.extract_strided_slice %0 {offsets = [1, 0, 0], sizes = [1, 8, 128], strides = [1, 1, 1]} : vector<5x8x128xf32> to vector<1x8x128xf32>
    %5 = vector.shape_cast %4 : vector<1x8x128xf32> to vector<8x128xf32>
    %6 = vector.extract_strided_slice %1 {offsets = [0, 0, 0], sizes = [1, 8, 128], strides = [1, 1, 1]} : vector<5x8x128xf32> to vector<1x8x128xf32>
    %7 = vector.shape_cast %6 : vector<1x8x128xf32> to vector<8x128xf32>
    %8 = vector.extract_strided_slice %1 {offsets = [1, 0, 0], sizes = [1, 8, 128], strides = [1, 1, 1]} : vector<5x8x128xf32> to vector<1x8x128xf32>
    %9 = vector.shape_cast %8 : vector<1x8x128xf32> to vector<8x128xf32>
    %10 = vector.extract_strided_slice %0 {offsets = [2, 0, 0], sizes = [1, 8, 128], strides = [1, 1, 1]} : vector<5x8x128xf32> to vector<1x8x128xf32>
    %11 = vector.shape_cast %10 : vector<1x8x128xf32> to vector<8x128xf32>
    %12 = vector.extract_strided_slice %0 {offsets = [3, 0, 0], sizes = [1, 8, 128], strides = [1, 1, 1]} : vector<5x8x128xf32> to vector<1x8x128xf32>
    %13 = vector.shape_cast %12 : vector<1x8x128xf32> to vector<8x128xf32>
    %14 = vector.extract_strided_slice %0 {offsets = [4, 0, 0], sizes = [1, 8, 128], strides = [1, 1, 1]} : vector<5x8x128xf32> to vector<1x8x128xf32>
    %15 = vector.shape_cast %14 : vector<1x8x128xf32> to vector<8x128xf32>
    %cst = arith.constant 1.000000e-07 : f32
    %cst_5 = arith.constant 1.000000e+07 : f32
    %16 = vector.broadcast %cst : f32 to vector<8x128xf32>
    %17 = arith.maximumf %16, %11 : vector<8x128xf32>
    %18 = vector.broadcast %cst_5 : f32 to vector<8x128xf32>
    %19 = arith.minimumf %18, %17 : vector<8x128xf32>
    %cst_6 = arith.constant 1.000000e-07 : f32
    %cst_7 = arith.constant 1.000000e+07 : f32
    %20 = vector.broadcast %cst_6 : f32 to vector<8x128xf32>
    %21 = arith.maximumf %20, %13 : vector<8x128xf32>
    %22 = vector.broadcast %cst_7 : f32 to vector<8x128xf32>
    %23 = arith.minimumf %22, %21 : vector<8x128xf32>
    %24 = math.cos %15 : vector<8x128xf32>
    %25 = math.sin %15 : vector<8x128xf32>
    %cst_8 = arith.constant 5.000000e-01 : f32
    %26 = vector.broadcast %cst_8 : f32 to vector<8x128xf32>
    %27 = arith.mulf %26, %19 : vector<8x128xf32>
    %28 = arith.mulf %27, %27 : vector<8x128xf32>
    %cst_9 = arith.constant 5.000000e-01 : f32
    %29 = vector.broadcast %cst_9 : f32 to vector<8x128xf32>
    %30 = arith.mulf %29, %23 : vector<8x128xf32>
    %31 = arith.mulf %30, %30 : vector<8x128xf32>
    %32 = arith.mulf %24, %24 : vector<8x128xf32>
    %33 = arith.mulf %32, %28 : vector<8x128xf32>
    %34 = arith.mulf %25, %25 : vector<8x128xf32>
    %35 = arith.mulf %34, %31 : vector<8x128xf32>
    %36 = arith.addf %33, %35 : vector<8x128xf32>
    %37 = arith.mulf %24, %25 : vector<8x128xf32>
    %38 = arith.subf %28, %31 : vector<8x128xf32>
    %39 = arith.mulf %37, %38 : vector<8x128xf32>
    %40 = arith.mulf %25, %25 : vector<8x128xf32>
    %41 = arith.mulf %40, %28 : vector<8x128xf32>
    %42 = arith.mulf %24, %24 : vector<8x128xf32>
    %43 = arith.mulf %42, %31 : vector<8x128xf32>
    %44 = arith.addf %41, %43 : vector<8x128xf32>
    %45 = vector.extract_strided_slice %1 {offsets = [2, 0, 0], sizes = [1, 8, 128], strides = [1, 1, 1]} : vector<5x8x128xf32> to vector<1x8x128xf32>
    %46 = vector.shape_cast %45 : vector<1x8x128xf32> to vector<8x128xf32>
    %47 = vector.extract_strided_slice %1 {offsets = [3, 0, 0], sizes = [1, 8, 128], strides = [1, 1, 1]} : vector<5x8x128xf32> to vector<1x8x128xf32>
    %48 = vector.shape_cast %47 : vector<1x8x128xf32> to vector<8x128xf32>
    %49 = vector.extract_strided_slice %1 {offsets = [4, 0, 0], sizes = [1, 8, 128], strides = [1, 1, 1]} : vector<5x8x128xf32> to vector<1x8x128xf32>
    %50 = vector.shape_cast %49 : vector<1x8x128xf32> to vector<8x128xf32>
    %cst_10 = arith.constant 1.000000e-07 : f32
    %cst_11 = arith.constant 1.000000e+07 : f32
    %51 = vector.broadcast %cst_10 : f32 to vector<8x128xf32>
    %52 = arith.maximumf %51, %46 : vector<8x128xf32>
    %53 = vector.broadcast %cst_11 : f32 to vector<8x128xf32>
    %54 = arith.minimumf %53, %52 : vector<8x128xf32>
    %cst_12 = arith.constant 1.000000e-07 : f32
    %cst_13 = arith.constant 1.000000e+07 : f32
    %55 = vector.broadcast %cst_12 : f32 to vector<8x128xf32>
    %56 = arith.maximumf %55, %48 : vector<8x128xf32>
    %57 = vector.broadcast %cst_13 : f32 to vector<8x128xf32>
    %58 = arith.minimumf %57, %56 : vector<8x128xf32>
    %59 = math.cos %50 : vector<8x128xf32>
    %60 = math.sin %50 : vector<8x128xf32>
    %cst_14 = arith.constant 5.000000e-01 : f32
    %61 = vector.broadcast %cst_14 : f32 to vector<8x128xf32>
    %62 = arith.mulf %61, %54 : vector<8x128xf32>
    %63 = arith.mulf %62, %62 : vector<8x128xf32>
    %cst_15 = arith.constant 5.000000e-01 : f32
    %64 = vector.broadcast %cst_15 : f32 to vector<8x128xf32>
    %65 = arith.mulf %64, %58 : vector<8x128xf32>
    %66 = arith.mulf %65, %65 : vector<8x128xf32>
    %67 = arith.mulf %59, %59 : vector<8x128xf32>
    %68 = arith.mulf %67, %63 : vector<8x128xf32>
    %69 = arith.mulf %60, %60 : vector<8x128xf32>
    %70 = arith.mulf %69, %66 : vector<8x128xf32>
    %71 = arith.addf %68, %70 : vector<8x128xf32>
    %72 = arith.mulf %59, %60 : vector<8x128xf32>
    %73 = arith.subf %63, %66 : vector<8x128xf32>
    %74 = arith.mulf %72, %73 : vector<8x128xf32>
    %75 = arith.mulf %60, %60 : vector<8x128xf32>
    %76 = arith.mulf %75, %63 : vector<8x128xf32>
    %77 = arith.mulf %59, %59 : vector<8x128xf32>
    %78 = arith.mulf %77, %66 : vector<8x128xf32>
    %79 = arith.addf %76, %78 : vector<8x128xf32>
    %80 = arith.subf %3, %7 : vector<8x128xf32>
    %81 = math.absf %80 : vector<8x128xf32>
    %cst_16 = arith.constant 0.111111112 : f32
    %82 = vector.broadcast %cst_16 : f32 to vector<8x128xf32>
    %83 = arith.cmpf olt, %81, %82 : vector<8x128xf32>
    %84 = arith.mulf %81, %81 : vector<8x128xf32>
    %cst_17 = arith.constant 4.500000e+00 : f32
    %85 = vector.broadcast %cst_17 : f32 to vector<8x128xf32>
    %86 = arith.mulf %84, %85 : vector<8x128xf32>
    %cst_18 = arith.constant 0.055555556 : f32
    %87 = vector.broadcast %cst_18 : f32 to vector<8x128xf32>
    %88 = arith.subf %81, %87 : vector<8x128xf32>
    %89 = arith.select %83, %86, %88 : vector<8x128xi1>, vector<8x128xf32>
    %90 = arith.subf %5, %9 : vector<8x128xf32>
    %91 = math.absf %90 : vector<8x128xf32>
    %cst_19 = arith.constant 0.111111112 : f32
    %92 = vector.broadcast %cst_19 : f32 to vector<8x128xf32>
    %93 = arith.cmpf olt, %91, %92 : vector<8x128xf32>
    %94 = arith.mulf %91, %91 : vector<8x128xf32>
    %cst_20 = arith.constant 4.500000e+00 : f32
    %95 = vector.broadcast %cst_20 : f32 to vector<8x128xf32>
    %96 = arith.mulf %94, %95 : vector<8x128xf32>
    %cst_21 = arith.constant 0.055555556 : f32
    %97 = vector.broadcast %cst_21 : f32 to vector<8x128xf32>
    %98 = arith.subf %91, %97 : vector<8x128xf32>
    %99 = arith.select %93, %96, %98 : vector<8x128xi1>, vector<8x128xf32>
    %100 = arith.addf %89, %99 : vector<8x128xf32>
    %101 = arith.mulf %36, %44 : vector<8x128xf32>
    %102 = arith.mulf %39, %39 : vector<8x128xf32>
    %103 = arith.subf %101, %102 : vector<8x128xf32>
    %104 = arith.mulf %71, %79 : vector<8x128xf32>
    %105 = arith.mulf %74, %74 : vector<8x128xf32>
    %106 = arith.subf %104, %105 : vector<8x128xf32>
    %cst_22 = arith.constant 1.000000e-07 : f32
    %107 = vector.broadcast %cst_22 : f32 to vector<8x128xf32>
    %108 = arith.maximumf %103, %107 : vector<8x128xf32>
    %109 = math.sqrt %108 : vector<8x128xf32>
    %cst_23 = arith.constant 4.000000e+00 : f32
    %110 = vector.broadcast %cst_23 : f32 to vector<8x128xf32>
    %111 = arith.mulf %110, %109 : vector<8x128xf32>
    %cst_24 = arith.constant 1.000000e-07 : f32
    %112 = vector.broadcast %cst_24 : f32 to vector<8x128xf32>
    %113 = arith.maximumf %106, %112 : vector<8x128xf32>
    %114 = math.sqrt %113 : vector<8x128xf32>
    %cst_25 = arith.constant 4.000000e+00 : f32
    %115 = vector.broadcast %cst_25 : f32 to vector<8x128xf32>
    %116 = arith.mulf %115, %114 : vector<8x128xf32>
    %117 = arith.addf %36, %71 : vector<8x128xf32>
    %118 = arith.addf %39, %74 : vector<8x128xf32>
    %119 = arith.addf %44, %79 : vector<8x128xf32>
    %120 = arith.mulf %117, %119 : vector<8x128xf32>
    %121 = arith.mulf %118, %118 : vector<8x128xf32>
    %122 = arith.subf %120, %121 : vector<8x128xf32>
    %123 = tpu.reciprocal %122 : vector<8x128xf32> -> vector<8x128xf32>
    %124 = arith.mulf %119, %123 : vector<8x128xf32>
    %cst_26 = arith.constant 0.000000e+00 : f32
    %125 = vector.broadcast %cst_26 : f32 to vector<8x128xf32>
    %126 = arith.subf %125, %118 : vector<8x128xf32>
    %127 = arith.mulf %126, %123 : vector<8x128xf32>
    %128 = arith.mulf %117, %123 : vector<8x128xf32>
    %129 = arith.mulf %36, %124 : vector<8x128xf32>
    %130 = arith.mulf %39, %127 : vector<8x128xf32>
    %131 = arith.addf %129, %130 : vector<8x128xf32>
    %132 = arith.mulf %36, %127 : vector<8x128xf32>
    %133 = arith.mulf %39, %128 : vector<8x128xf32>
    %134 = arith.addf %132, %133 : vector<8x128xf32>
    %135 = arith.mulf %39, %124 : vector<8x128xf32>
    %136 = arith.mulf %44, %127 : vector<8x128xf32>
    %137 = arith.addf %135, %136 : vector<8x128xf32>
    %138 = arith.mulf %39, %127 : vector<8x128xf32>
    %139 = arith.mulf %44, %128 : vector<8x128xf32>
    %140 = arith.addf %138, %139 : vector<8x128xf32>
    %141 = arith.mulf %131, %36 : vector<8x128xf32>
    %142 = arith.mulf %134, %39 : vector<8x128xf32>
    %143 = arith.addf %141, %142 : vector<8x128xf32>
    %144 = arith.subf %36, %143 : vector<8x128xf32>
    %145 = arith.mulf %131, %39 : vector<8x128xf32>
    %146 = arith.mulf %134, %44 : vector<8x128xf32>
    %147 = arith.addf %145, %146 : vector<8x128xf32>
    %148 = arith.subf %39, %147 : vector<8x128xf32>
    %149 = arith.mulf %137, %39 : vector<8x128xf32>
    %150 = arith.mulf %140, %44 : vector<8x128xf32>
    %151 = arith.addf %149, %150 : vector<8x128xf32>
    %152 = arith.subf %44, %151 : vector<8x128xf32>
    %153 = arith.mulf %144, %152 : vector<8x128xf32>
    %154 = arith.mulf %148, %148 : vector<8x128xf32>
    %155 = arith.subf %153, %154 : vector<8x128xf32>
    %cst_27 = arith.constant 1.000000e-07 : f32
    %156 = vector.broadcast %cst_27 : f32 to vector<8x128xf32>
    %157 = arith.maximumf %155, %156 : vector<8x128xf32>
    %158 = math.sqrt %157 : vector<8x128xf32>
    %cst_28 = arith.constant 4.000000e+00 : f32
    %159 = vector.broadcast %cst_28 : f32 to vector<8x128xf32>
    %160 = arith.mulf %159, %158 : vector<8x128xf32>
    %161 = arith.cmpf one, %160, %160 : vector<8x128xf32>
    %cst_29 = arith.constant 0.000000e+00 : f32
    %162 = vector.broadcast %cst_29 : f32 to vector<8x128xf32>
    %163 = arith.select %161, %162, %160 : vector<8x128xi1>, vector<8x128xf32>
    %164 = arith.addf %111, %116 : vector<8x128xf32>
    %165 = arith.subf %164, %163 : vector<8x128xf32>
    %cst_30 = arith.constant 9.99999997E-7 : f32
    %166 = vector.broadcast %cst_30 : f32 to vector<8x128xf32>
    %167 = arith.addf %165, %166 : vector<8x128xf32>
    %168 = tpu.reciprocal %167 : vector<8x128xf32> -> vector<8x128xf32>
    %169 = arith.mulf %163, %168 : vector<8x128xf32>
    %cst_31 = arith.constant 1.000000e+00 : f32
    %170 = vector.broadcast %cst_31 : f32 to vector<8x128xf32>
    %171 = arith.subf %170, %169 : vector<8x128xf32>
    %cst_32 = arith.constant 0.00999999977 : f32
    %172 = vector.broadcast %cst_32 : f32 to vector<8x128xf32>
    %173 = arith.mulf %172, %100 : vector<8x128xf32>
    %174 = arith.addf %173, %171 : vector<8x128xf32>
    %cst_33 = arith.constant 1.000000e-07 : f32
    %175 = vector.broadcast %cst_33 : f32 to vector<8x128xf32>
    %176 = arith.maximumf %174, %175 : vector<8x128xf32>
    %c0_34 = arith.constant 0 : index
    %c0_35 = arith.constant 0 : index
    %c0_36 = arith.constant 0 : index
    %177 = vector.load %arg3[%c0_34, %c0_35, %c0_36] : memref<2x8x128xf32, #tpu.memory_space<vmem>>, vector<1x8x128xf32>
    %178 = vector.shape_cast %177 : vector<1x8x128xf32> to vector<8x128xf32>
    %179 = vector.shape_cast %176 : vector<8x128xf32> to vector<1x8x128xf32>
    tpu.vector_store %arg3[%c0_34, %c0_35, %c0_36], %179 {strides = array<i32>} : memref<2x8x128xf32, #tpu.memory_space<vmem>>, vector<1x8x128xf32>,
    %180 = math.log1p %176 : vector<8x128xf32>
    %cst_37 = arith.constant 1.000000e+00 : f32
    %181 = vector.broadcast %cst_37 : f32 to vector<8x128xf32>
    %182 = arith.addf %181, %180 : vector<8x128xf32>
    %183 = tpu.reciprocal %182 : vector<8x128xf32> -> vector<8x128xf32>
    %c1 = arith.constant 1 : index
    %c0_38 = arith.constant 0 : index
    %c0_39 = arith.constant 0 : index
    %184 = vector.load %arg3[%c1, %c0_38, %c0_39] : memref<2x8x128xf32, #tpu.memory_space<vmem>>, vector<1x8x128xf32>
    %185 = vector.shape_cast %184 : vector<1x8x128xf32> to vector<8x128xf32>
    %186 = vector.shape_cast %183 : vector<8x128xf32> to vector<1x8x128xf32>
    tpu.vector_store %arg3[%c1, %c0_38, %c0_39], %186 {strides = array<i32>} : memref<2x8x128xf32, #tpu.memory_space<vmem>>, vector<1x8x128xf32>,
    return
  }
  func.func @transform_0(%arg0: i32) -> (i32, i32, i32) {
    %c0_i32 = arith.constant 0 : i32
    %c0_i32_0 = arith.constant 0 : i32
    %c0_i32_1 = arith.constant 0 : i32
    return %c0_i32, %arg0, %c0_i32_0 : i32, i32, i32
  }
  func.func @transform_1(%arg0: i32) -> (i32, i32, i32) {
    %c0_i32 = arith.constant 0 : i32
    %c0_i32_0 = arith.constant 0 : i32
    %c0_i32_1 = arith.constant 0 : i32
    return %c0_i32, %arg0, %c0_i32_0 : i32, i32, i32
  }
  func.func @transform_2(%arg0: i32) -> (i32, i32, i32) {
    %c0_i32 = arith.constant 0 : i32
    %c0_i32_0 = arith.constant 0 : i32
    %c0_i32_1 = arith.constant 0 : i32
    return %c0_i32, %arg0, %c0_i32_0 : i32, i32, i32
  }
}

</mosaic_0001>

<bundles_post_ra>
// kernel: tpu_custom_call.1
= control target key start
LH: loop header
LB: loop body
LE: loop exit
PB: predicated region body
PF: predicated region fallthrough
CT: control target
= control target key end

     0   :  { %7 = vsyncpa [#allocation3], 0  ;;  %s1279_s0 = inlined_call_operand.hbm [shape: f32[5,8,128], index: 0, kind: input, shape index: {}]   ;;  %s1280_s1 = inlined_call_operand.hbm [shape: f32[5,8,128], index: 1, kind: input, shape index: {}]   ;;  %s1281_s2 = inlined_call_operand.hbm [shape: f32[2,8,128], index: 2, kind: output, shape index: {}]  }
   0x1   :  { %8 = vsyncpa [#allocation6], 0 }
   0x2   :  { %9 = vsyncpa [#allocation4], 0  ;;  %s14_s11 = sshll.u32 %s1279_s0, 4  ;;  %s1012_s12 = smov [#allocation2]   ;;  %s15_s11 = int_to_ptr.hbm [resolvable:$true] %s14_s11 }
   0x3   :  { %s16_s13 = sshll.u32 %s1012_s12, 4  ;;  %s27_s16 = sshll.u32 %s1280_s1, 4  ;;  %s17_s13 = int_to_ptr.vmem [resolvable:$true] %s16_s13  ;;  %s28_s16 = int_to_ptr.hbm [resolvable:$true] %s27_s16 }
   0x4   :  { %s1013_s17 = smov 128   ;;  %s1014_s18 = smov 8  }
   0x5   :  { %22 = dma.hbm_to_vmem [thread:$0]  %s15_s11, 640, %s17_s13, [#allocation3], %s1013_s17, %s1013_s17, %s1014_s18  }
   0x6   :  { %s1015_s19 = smov [#allocation5]  }
   0x7   :  { %s29_s20 = sshll.u32 %s1015_s19, 4  ;;  %s30_s20 = int_to_ptr.vmem [resolvable:$true] %s29_s20 }
   0x8   :  { %35 = dma.hbm_to_vmem [thread:$0]  %s28_s16, 640, %s30_s20, [#allocation6], %s1013_s17, %s1013_s17, %s1014_s18  }
   0x9   :  { %1006 = dma.done.wait [#allocation3], 640  }
   0xa   :  { %1007 = vsyncadd [#allocation3], 4294966656 }
   0xb   :  { %1008 = dma.done.wait [#allocation6], 640  }
   0xc   :  { %1009 = vsyncadd [#allocation6], 4294966656  ;;  %v1051_v0 = vld [vmem:[#allocation2 + $0x20] sm:$0xff]  ;;  %v1053_v1 = vld [vmem:[#allocation5 + $0x20] sm:$0xff]  ;;  %v1016_v23 = vmov 683565275  }
   0xd   :  { %v58_v2 = vand.u32 2147483647, %v1051_v0  ;;  %v61_v3 = vand.u32 2139095040, %v1051_v0  ;;  %v386_v4 = vand.u32 2147483647, %v1053_v1  ;;  %v389_v5 = vand.u32 2139095040, %v1053_v1 }
   0xe   :  { %v1017_v25 = vmov 2475754826   ;;  %v1018_v27 = vmov 2131351028   ;;  %v1019_v29 = vmov 2102212464  }
   0xf   :  { %v62_v6 = vshrl.u32 %v61_v3, 23  ;;  %v65_v7 = vand.u32 8388607, %v58_v2  ;;  %v390_v8 = vshrl.u32 %v389_v5, 23  ;;  %v393_v12 = vand.u32 8388607, %v386_v4 }
  0x10   :  { %v1020_v31 = vmov 920167782   ;;  %v1021_v40 = vmov 1326507024   ;;  %s1023_s0 = smov [#allocation7]   ;;  %s880_s23 = sshll.u32 %s1281_s2, 4  ;;  %s881_s23 = int_to_ptr.hbm [resolvable:$true] %s880_s23 }
  0x11   :  { %v894_v9 = vadd.s32 4294967169, %v62_v6  ;;  %v66_v10 = vor.u32 8388608, %v65_v7  ;;  %v900_v11 = vadd.s32 4294967169, %v390_v8  ;;  %v394_v17 = vor.u32 8388608, %v393_v12  ;;  %s878_s1 = sshll.u32 %s1023_s0, 4  ;;  %s879_s1 = int_to_ptr.vmem [resolvable:$true] %s878_s1 }
  0x13   :  { %v68_v13 = vadd.s32 1, %v894_v9  ;;  %v396_v14 = vadd.s32 1, %v900_v11  ;;  %v1063_v16 = vshll.u32 %v66_v10, 8  ;;  %v1073_v34 = vshll.u32 %v394_v17, 8 }
  0x15   :  { %vm69_vm0 = vcmp.gt.s32.totalorder %v68_v13, 0  ;;  %vm397_vm1 = vcmp.gt.s32.totalorder %v396_v14, 0  ;;  %v107_v33 = vand.u32 65535, %v1063_v16  ;;  %v108_v38 = vshrl.u32 %v1063_v16, 16 }
  0x16   :  { %v70_v15 = vsel %vm69_vm0, %v68_v13, 0  ;;  %v398_v19 = vsel %vm397_vm1, %v396_v14, 0 }
  0x17   :  { %v72_v18 = vand.u32 31, %v70_v15  ;;  %v1065_v20 = vshrl.u32 %v70_v15, 5  ;;  %v1067_v21 = vand.u32 31, %v398_v19  ;;  %v1091_v51 = vshrl.u32 %v398_v19, 5 }
  0x19   :  { %v73_v22 = vsub.s32 32, %v72_v18  ;;  %v75_v24 = vshll.u32 %v1016_v23, %v72_v18  ;;  %v78_v26 = vshll.u32 %v1017_v25, %v72_v18  ;;  %v81_v28 = vshll.u32 %v1018_v27, %v72_v18 }
  0x1a   :  { %v84_v30 = vshll.u32 %v1019_v29, %v72_v18  ;;  %v87_v32 = vshll.u32 %v1020_v31, %v72_v18  ;;  %vm90_vm2 = vcmp.lt.s32.totalorder %v1065_v20, 1  ;;  %vm93_vm3 = vcmp.lt.s32.totalorder %v1065_v20, 4 }
  0x1b   :  { %v76_v35 = vshrl.u32 %v1017_v25, %v73_v22  ;;  %v79_v36 = vshrl.u32 %v1018_v27, %v73_v22  ;;  %v82_v37 = vshrl.u32 %v1019_v29, %v73_v22  ;;  %v85_v39 = vshrl.u32 %v1020_v31, %v73_v22 }
  0x1c   :  { %v88_v41 = vshrl.u32 %v1021_v40, %v73_v22  ;;  %v1082_v45 = vsub.s32 32, %v1067_v21  ;;  %v74_v46 = vshrl.u32 %v1016_v23, %v73_v22  ;;  %vm92_vm4 = vcmp.lt.s32.totalorder %v1065_v20, 3 }
  0x1d   :  { %v77_v42 = vor.u32 %v76_v35, %v75_v24  ;;  %v80_v43 = vor.u32 %v79_v36, %v78_v26  ;;  %v83_v44 = vor.u32 %v82_v37, %v81_v28  ;;  %v86_v47 = vor.u32 %v85_v39, %v84_v30 }
  0x1e   :  { %v89_v48 = vor.u32 %v88_v41, %v87_v32  ;;  %vm91_vm5 = vcmp.lt.s32.totalorder %v1065_v20, 2  ;;  %v403_v54 = vshll.u32 %v1016_v23, %v1067_v21  ;;  %v406_v55 = vshll.u32 %v1017_v25, %v1067_v21 }
  0x1f   :  { %v98_v49 = vsel %vm90_vm2, %v77_v42, %v80_v43  ;;  %v102_v50 = vsel %vm90_vm2, %v80_v43, %v83_v44  ;;  %v99_v52 = vsel %vm93_vm3, %v86_v47, 920167782  ;;  %v95_v56 = vsel %vm93_vm3, %v83_v44, 2102212464 }
  0x20   :  { %v103_v53 = vsel %vm93_vm3, %v89_v48, 1326507024  ;;  %v100_v57 = vsel %vm92_vm4, %v83_v44, %v99_v52  ;;  %v404_v59 = vshrl.u32 %v1017_v25, %v1082_v45  ;;  %v94_v60 = vsel %vm90_vm2, %v74_v46, %v77_v42 }
  0x21   :  { %v104_v58 = vsel %vm92_vm4, %v86_v47, %v103_v53  ;;  %v101_v61 = vsel %vm91_vm5, %v98_v49, %v100_v57  ;;  %v407_v63 = vshrl.u32 %v1018_v27, %v1082_v45  ;;  %v96_v8 = vsel %vm92_vm4, %v80_v43, %v95_v56 }
  0x22   :  { %v105_v62 = vsel %vm91_vm5, %v102_v50, %v104_v58  ;;  %v131_v6 = vand.u32 65535, %v101_v61  ;;  %v132_v7 = vshrl.u32 %v101_v61, 16  ;;  %v1116_v9 = vor.u32 %v404_v59, %v403_v54 }
  0x23   :  { %v109_v3 = vand.u32 65535, %v105_v62  ;;  %v110_v5 = vshrl.u32 %v105_v62, 16  ;;  %v1118_v10 = vor.u32 %v407_v63, %v406_v55  ;;  %v409_v11 = vshll.u32 %v1018_v27, %v1067_v21 }
  0x24   :  { %v410_v15 = vshrl.u32 %v1019_v29, %v1082_v45  ;;  %v133_v18 = vmul.u32 %v131_v6, %v107_v33  ;;  %v134_v19 = vmul.u32 %v132_v7, %v107_v33  ;;  %v135_v22 = vmul.u32 %v131_v6, %v108_v38 }
  0x25   :  { %v111_v12 = vmul.u32 %v109_v3, %v107_v33  ;;  %v112_v13 = vmul.u32 %v110_v5, %v107_v33  ;;  %v113_v14 = vmul.u32 %v109_v3, %v108_v38  ;;  %v114_v17 = vmul.u32 %v110_v5, %v108_v38 }
  0x26   :  { %v136_v28 = vmul.u32 %v132_v7, %v108_v38  ;;  %v137_v32 = vshll.u32 %v134_v19, 16  ;;  %v138_v35 = vshrl.u32 %v134_v19, 16  ;;  %v139_v36 = vshll.u32 %v135_v22, 16 }
  0x27   :  { %v115_v24 = vshll.u32 %v112_v13, 16  ;;  %v116_v25 = vshrl.u32 %v112_v13, 16  ;;  %v117_v26 = vshll.u32 %v113_v14, 16  ;;  %v118_v30 = vshrl.u32 %v113_v14, 16 }
  0x28   :  { %v140_v37 = vshrl.u32 %v135_v22, 16  ;;  %v412_v39 = vshll.u32 %v1019_v29, %v1067_v21  ;;  %v1022_v41 = vmov 0   ;;  %vm141_vm7 = vc.u32 %v133_v18, %v137_v32 }
  0x29   :  { %vm119_vm6 = vc.u32 %v111_v12, %v115_v24  ;;  %v121_v27 = vadd.s32 %v115_v24, %v111_v12  ;;  %v143_v33 = vadd.s32 %v137_v32, %v133_v18  ;;  %v413_v43 = vshrl.u32 %v1020_v31, %v1082_v45 }
  0x2a   :  { %v120_v42 = vsel %vm119_vm6, 1, %v1022_v41  ;;  %v142_v38 = vsel %vm141_vm7, 1, %v1022_v41  ;;  %v415_v46 = vshll.u32 %v1020_v31, %v1067_v21  ;;  %v411_v29 = vor.u32 %v410_v15, %v409_v11 }
  0x2b   :  { %v122_v44 = vadd.s32 %v120_v42, %v114_v17  ;;  %vm123_vm8 = vc.u32 %v121_v27, %v117_v26  ;;  %v144_v48 = vadd.s32 %v142_v38, %v136_v28  ;;  %vm145_vm9 = vc.u32 %v143_v33, %v139_v36 }
  0x2c   :  { %v124_v47 = vsel %vm123_vm8, 1, %v1022_v41  ;;  %v146_v50 = vsel %vm145_vm9, 1, %v1022_v41  ;;  %v414_v52 = vor.u32 %v413_v43, %v412_v39  ;;  %v416_v53 = vshrl.u32 %v1021_v40, %v1082_v45 }
  0x2d   :  { %v126_v49 = vadd.s32 %v124_v47, %v122_v44  ;;  %v1135_v54 = vadd.s32 %v143_v33, %v139_v36  ;;  %v148_v55 = vadd.s32 %v146_v50, %v144_v48  ;;  %vm418_vm10 = vcmp.lt.s32.totalorder %v1091_v51, 1 }
  0x2e   :  { %vm420_vm11 = vcmp.lt.s32.totalorder %v1091_v51, 3  ;;  %v417_v31 = vor.u32 %v416_v53, %v415_v46  ;;  %vm419_vm12 = vcmp.lt.s32.totalorder %v1091_v51, 2  ;;  %vm421_vm13 = vcmp.lt.s32.totalorder %v1091_v51, 4 }
  0x2f   :  { %v127_v21 = vadd.s32 %v126_v49, %v116_v25  ;;  %v97_v56 = vsel %vm91_vm5, %v94_v60, %v96_v8  ;;  %v149_v57 = vadd.s32 %v148_v55, %v138_v35  ;;  %v426_v40 = vsel %vm418_vm10, %v1116_v9, %v1118_v10 }
  0x30   :  { %v427_v58 = vsel %vm421_vm13, %v414_v52, 920167782  ;;  %v430_v62 = vsel %vm418_vm10, %v1118_v10, %v411_v29  ;;  %v435_v20 = vand.u32 65535, %v1073_v34  ;;  %v431_v3 = vsel %vm421_vm13, %v417_v31, 1326507024 }
  0x31   :  { %v1149_v59 = vadd.s32 %v127_v21, %v118_v30  ;;  %v428_v61 = vsel %vm420_vm11, %v411_v29, %v427_v58  ;;  %v150_v60 = vadd.s32 %v149_v57, %v140_v37  ;;  %v436_v5 = vshrl.u32 %v1073_v34, 16 }
  0x32   :  { %v429_v63 = vsel %vm419_vm12, %v426_v40, %v428_v61  ;;  %v151_v6 = vmul.u32 %v1063_v16, %v97_v56  ;;  %v432_v7 = vsel %vm420_vm11, %v414_v52, %v431_v3  ;;  %v402_v14 = vshrl.u32 %v1016_v23, %v1082_v45 }
  0x33   :  { %vm153_vm14 = vc.u32 %v1149_v59, %v1135_v54  ;;  %v459_v8 = vand.u32 65535, %v429_v63  ;;  %v154_v11 = vadd.s32 1, %v150_v60  ;;  %v433_v12 = vsel %vm419_vm12, %v430_v62, %v432_v7 }
  0x34   :  { %v460_v13 = vshrl.u32 %v429_v63, 16  ;;  %v437_v15 = vand.u32 65535, %v433_v12  ;;  %v438_v17 = vshrl.u32 %v433_v12, 16  ;;  %v423_v35 = vsel %vm421_vm13, %v411_v29, 2102212464 }
  0x35   :  { %v155_v18 = vsel %vm153_vm14, %v154_v11, %v150_v60  ;;  %v461_v19 = vmul.u32 %v459_v8, %v435_v20  ;;  %v463_v22 = vmul.u32 %v459_v8, %v436_v5  ;;  %v422_v23 = vsel %vm418_vm10, %v402_v14, %v1116_v9 }
  0x36   :  { %v462_v16 = vmul.u32 %v460_v13, %v435_v20  ;;  %v156_v24 = vadd.s32 %v155_v18, %v151_v6  ;;  %v439_v25 = vmul.u32 %v437_v15, %v435_v20  ;;  %v440_v26 = vmul.u32 %v438_v17, %v435_v20 }
  0x37   :  { %v441_v28 = vmul.u32 %v437_v15, %v436_v5  ;;  %v442_v36 = vmul.u32 %v438_v17, %v436_v5  ;;  %v464_v37 = vmul.u32 %v460_v13, %v436_v5  ;;  %v467_v39 = vshll.u32 %v463_v22, 16 }
  0x38   :  { %v465_v30 = vshll.u32 %v462_v16, 16  ;;  %v157_v32 = vadd.s32 536870912, %v156_v24  ;;  %v443_v27 = vshll.u32 %v440_v26, 16  ;;  %v424_v43 = vsel %vm420_vm11, %v1118_v10, %v423_v35 }
  0x39   :  { %v445_v45 = vshll.u32 %v441_v28, 16  ;;  %v444_v9 = vshrl.u32 %v440_v26, 16  ;;  %v466_v49 = vshrl.u32 %v462_v16, 16  ;;  %v446_v53 = vshrl.u32 %v441_v28, 16 }
  0x3a   :  { %v1176_v42 = vshrl.u32 %v157_v32, 30  ;;  %vm447_vm15 = vc.u32 %v439_v25, %v443_v27  ;;  %v449_v33 = vadd.s32 %v443_v27, %v439_v25  ;;  %vm469_vm0 = vc.u32 %v461_v19, %v465_v30 }
  0x3b   :  { %v448_v44 = vsel %vm447_vm15, 1, %v1022_v41  ;;  %v470_v38 = vsel %vm469_vm0, 1, %v1022_v41  ;;  %v471_v46 = vadd.s32 %v465_v30, %v461_v19  ;;  %v468_v21 = vshrl.u32 %v463_v22, 16 }
  0x3c   :  { %v159_v47 = vshll.u32 %v1176_v42, 30  ;;  %v450_v48 = vadd.s32 %v448_v44, %v442_v36  ;;  %vm451_vm1 = vc.u32 %v449_v33, %v445_v45  ;;  %v472_v50 = vadd.s32 %v470_v38, %v464_v37 }
  0x3d   :  { %v452_v29 = vsel %vm451_vm1, 1, %v1022_v41  ;;  %vm473_vm2 = vc.u32 %v471_v46, %v467_v39  ;;  %v475_v40 = vadd.s32 %v471_v46, %v467_v39  ;;  %v425_v58 = vsel %vm419_vm12, %v422_v23, %v424_v43 }
  0x3e   :  { %v160_v52 = vsub.s32 %v156_v24, %v159_v47  ;;  %v454_v55 = vadd.s32 %v452_v29, %v450_v48  ;;  %v474_v10 = vsel %vm473_vm2, 1, %v1022_v41  ;;  %v479_v3 = vmul.u32 %v1073_v34, %v425_v58 }
  0x3f   :  { %v476_v31 = vadd.s32 %v474_v10, %v472_v50  ;;  %v152_v41 = vadd.s32 %v1135_v54, %v1149_v59  ;;  %vm60_vm6 = vcmp.lt.s32.totalorder %v1051_v0, 0  ;;  %vm1194_vm8 = vcmp.le.f32.partialorder %v58_v2, 0.7853982 }
  0x40   :  { %vm161_vm3 = vcmp.lt.s32.totalorder %v160_v52, 0  ;;  %v162_v56 = vsub.s32 0, %v160_v52  ;;  %v455_v57 = vadd.s32 %v454_v55, %v444_v9  ;;  %v182_v9 = vsub.s32 4, %v1176_v42 }
  0x41   :  { %v477_v61 = vadd.s32 %v476_v31, %v466_v49  ;;  %vm388_vm10 = vcmp.lt.s32.totalorder %v1053_v1, 0  ;;  %vm1212_vm11 = vcmp.le.f32.partialorder %v386_v4, 0.7853982  ;;  %vm201_vm2 = vweird.f32 %v1051_v0 }
  0x42   :  { %v163_v62 = vsel %vm161_vm3, %v162_v56, %v160_v52  ;;  %v456_v20 = vadd.s32 %v455_v57, %v446_v53  ;;  %v183_v10 = vsel %vm60_vm6, %v182_v9, %v1176_v42 }
  0x43   :  { %v164_v60 = vclz %v163_v62  ;;  %v478_v63 = vadd.s32 %v477_v61, %v468_v21  ;;  %v46_v61 = vld [vmem:[#allocation2 + $0x10] sm:$0xff]  ;;  %v47_v62 = vld [vmem:[#allocation2 + $0x18] sm:$0xff] }
  0x44   :  { %vm481_vm4 = vc.u32 %v456_v20, %v475_v40  ;;  %v480_v33 = vadd.s32 %v475_v40, %v456_v20  ;;  %v185_v40 = vsel %vm1194_vm8, 0, %v183_v10 }
  0x45   :  { %v895_v5 = vadd.s32 4294967294, %v164_v60  ;;  %v482_v6 = vadd.s32 1, %v478_v63 }
  0x47   :  { %vm896_vm5 = vcmp.lt.s32.totalorder %v895_v5, 0  ;;  %v483_v7 = vsel %vm481_vm4, %v482_v6, %v478_v63 }
  0x48   :  { %v167_v8 = vsel %vm896_vm5, 0, %v895_v5  ;;  %v484_v11 = vadd.s32 %v483_v7, %v479_v3  ;;  %v356_v3 = vadd.s32 3, %v185_v40  ;;  %v56_v7 = vmax.f32 %v47_v62, 1e-07 }
  0x49   :  { %v168_v12 = vsub.s32 32, %v167_v8  ;;  %v169_v51 = vshll.u32 %v160_v52, %v167_v8  ;;  %v172_v13 = vsub.s32 4294967266, %v167_v8  ;;  %v202_v8 = vand.u32 3, %v185_v40 }
  0x4a   :  { %v485_v17 = vadd.s32 536870912, %v484_v11 }
  0x4b   :  { %v170_v14 = vshrl.u32 %v152_v41, %v168_v12  ;;  %v173_v15 = vadd.s32 127, %v172_v13  ;;  %v54_v41 = vmax.f32 %v46_v61, 1e-07  ;;  %v357_v13 = vand.u32 3, %v356_v3 }
  0x4c   :  { %v486_v16 = vshrl.u32 %v485_v17, 30  ;;  %v51_v17 = vld [vmem:[#allocation5 + $0x10] sm:$0xff]  ;;  %vm204_vm12 = vcmp.eq.s32.totalorder %v202_v8, 0  ;;  %vm207_vm13 = vcmp.eq.s32.totalorder %v202_v8, 2  ;;  %vm203_vm0 = vcmp.lt.s32.totalorder %v202_v8, 2 }
  0x4d   :  { %v171_v18 = vor.u32 %v170_v14, %v169_v51  ;;  %v174_v19 = vshll.u32 %v173_v15, 23  ;;  %v55_v4 = vmin.f32 %v54_v41, 10000000.0  ;;  %vm359_vm14 = vcmp.eq.s32.totalorder %v357_v13, 0 }
  0x4e   :  { %v487_v24 = vshll.u32 %v486_v16, 30  ;;  %v510_v5 = vsub.s32 4, %v486_v16  ;;  %vm362_vm15 = vcmp.eq.s32.totalorder %v357_v13, 2  ;;  %vm358_vm1 = vcmp.lt.s32.totalorder %v357_v13, 2 }
  0x4f   :  { %v175_v34 = vor.u32 4788187, %v174_v19  ;;  %v178_v22 = vcvt.s32.f32 %v171_v18  ;;  %v52_v19 = vld [vmem:[#allocation5 + $0x18] sm:$0xff] }
  0x50   :  { %v488_v26 = vsub.s32 %v484_v11, %v487_v24  ;;  %v511_v14 = vsel %vm388_vm10, %v510_v5, %v486_v16 }
  0x51   :  { %v176_v25 = vand.u32 2147483647, %v175_v34  ;;  %v57_v34 = vmin.f32 %v56_v7, 10000000.0 }
  0x52   :  { %vm489_vm7 = vcmp.lt.s32.totalorder %v488_v26, 0  ;;  %v490_v54 = vsub.s32 0, %v488_v26 }
  0x53   :  { %v179_v28 = vmul.f32 %v178_v22, %v176_v25  ;;  %v513_v25 = vsel %vm1212_vm11, 0, %v511_v14 }
  0x54   :  { %v491_v32 = vsel %vm489_vm7, %v490_v54, %v488_v26  ;;  %v384_v54 = vmax.f32 %v52_v19, 1e-07  ;;  %v530_v9 = vand.u32 3, %v513_v25 }
  0x55   :  { %v180_v30 = vxor.u32 2147483648, %v179_v28  ;;  %v492_v36 = vclz %v491_v32  ;;  %v684_v32 = vadd.s32 3, %v513_v25 }
  0x56   :  { %vm531_vm3 = vcmp.lt.s32.totalorder %v530_v9, 2  ;;  %vm535_vm4 = vcmp.eq.s32.totalorder %v530_v9, 2 }
  0x57   :  { %v181_v35 = vsel %vm60_vm6, %v180_v30, %v179_v28  ;;  %v901_v45 = vadd.s32 4294967294, %v492_v36  ;;  %v382_v28 = vmax.f32 %v51_v17, 1e-07  ;;  %vm532_vm6 = vcmp.eq.s32.totalorder %v530_v9, 0 }
  0x58   :  { %v184_v27 = vsel %vm1194_vm8, %v1051_v0, %v181_v35 }
  0x59   :  { %v186_v23 = vmul.f32 %v184_v27, %v184_v27  ;;  %vm902_vm9 = vcmp.lt.s32.totalorder %v901_v45, 0 }
  0x5a   :  { %v495_v2 = vsel %vm902_vm9, 0, %v901_v45  ;;  %vm529_vm9 = vweird.f32 %v1053_v1 }
  0x5b   :  { %v187_v37 = vmul.f32 -0.001358992, %v186_v23  ;;  %v194_v39 = vmul.f32 -0.00019511016, %v186_v23  ;;  %v496_v38 = vsub.s32 32, %v495_v2  ;;  %v497_v46 = vshll.u32 %v488_v26, %v495_v2 }
  0x5c   :  { %v500_v47 = vsub.s32 4294967266, %v495_v2  ;;  %v385_v2 = vmin.f32 %v384_v54, 10000000.0 }
  0x5d   :  { %v188_v43 = vadd.f32 0.041655596, %v187_v37  ;;  %v195_v44 = vadd.f32 0.008332121, %v194_v39  ;;  %v498_v29 = vshrl.u32 %v480_v33, %v496_v38  ;;  %v367_v39 = vmul.f32 0.5, %v55_v4 }
  0x5e   :  { %v501_v50 = vadd.s32 127, %v500_v47  ;;  %v383_v33 = vmin.f32 %v382_v28, 10000000.0  ;;  %v369_v47 = vmul.f32 0.5, %v57_v34 }
  0x5f   :  { %v196_v48 = vmul.f32 %v195_v44, %v186_v23  ;;  %v189_v49 = vmul.f32 %v188_v43, %v186_v23  ;;  %v499_v53 = vor.u32 %v498_v29, %v497_v46  ;;  %v368_v10 = vmul.f32 %v367_v39, %v367_v39 }
  0x60   :  { %v502_v55 = vshll.u32 %v501_v50, 23 }
  0x61   :  { %v197_v52 = vadd.f32 -0.16666654, %v196_v48  ;;  %v190_v21 = vadd.f32 -0.4999988, %v189_v49  ;;  %v506_v57 = vcvt.s32.f32 %v499_v53  ;;  %v685_v48 = vand.u32 3, %v684_v32 }
  0x62   :  { %v503_v56 = vor.u32 4788187, %v502_v55  ;;  %v695_v53 = vmul.f32 0.5, %v383_v33  ;;  %v697_v55 = vmul.f32 0.5, %v385_v2 }
  0x63   :  { %v198_v31 = vmul.f32 %v197_v52, %v186_v23  ;;  %v191_v20 = vmul.f32 %v190_v21, %v186_v23  ;;  %vm690_vm5 = vcmp.eq.s32.totalorder %v685_v48, 2  ;;  %vm687_vm7 = vcmp.eq.s32.totalorder %v685_v48, 0 }
  0x64   :  { %v504_v58 = vand.u32 2147483647, %v503_v56  ;;  %v696_v61 = vmul.f32 %v695_v53, %v695_v53  ;;  %v698_v62 = vmul.f32 %v697_v55, %v697_v55  ;;  %vm686_vm8 = vcmp.lt.s32.totalorder %v685_v48, 2 }
  0x65   :  { %v199_v60 = vadd.f32 1.0, %v198_v31  ;;  %v192_v11 = vadd.f32 1.0, %v191_v20  ;;  %v370_v31 = vmul.f32 %v369_v47, %v369_v47 }
  0x66   :  { %v507_v63 = vmul.f32 %v506_v57, %v504_v58 }
  0x67   :  { %v200_v12 = vmul.f32 %v199_v60, %v184_v27  ;;  %v208_v24 = vxor.u32 2147483648, %v192_v11  ;;  %v377_v5 = vsub.f32 %v368_v10, %v370_v31 }
  0x68   :  { %v508_v6 = vxor.u32 2147483648, %v507_v63 }
  0x69   :  { %v205_v22 = vxor.u32 2147483648, %v200_v12  ;;  %v209_v36 = vsel %vm207_vm13, %v208_v24, %v200_v12  ;;  %v364_v23 = vsel %vm362_vm15, %v208_v24, %v200_v12  ;;  %v705_v12 = vsub.f32 %v696_v61, %v698_v62 }
  0x6a   :  { %v509_v51 = vsel %vm388_vm10, %v508_v6, %v507_v63 }
  0x6b   :  { %v512_v15 = vsel %vm1212_vm11, %v1053_v1, %v509_v51  ;;  %v206_v35 = vsel %vm204_vm12, %v192_v11, %v205_v22  ;;  %v361_v27 = vsel %vm359_vm14, %v192_v11, %v205_v22 }
  0x6c   :  { %v514_v18 = vmul.f32 %v512_v15, %v512_v15  ;;  %v210_v43 = vsel %vm203_vm0, %v206_v35, %v209_v36  ;;  %v365_v44 = vsel %vm358_vm1, %v361_v27, %v364_v23 }
  0x6d   :  { %v211_v50 = vsel %vm201_vm2, nan, %v210_v43  ;;  %v366_v52 = vsel %vm201_vm2, nan, %v365_v44 }
  0x6e   :  { %v515_v26 = vmul.f32 -0.001358992, %v514_v18  ;;  %v522_v16 = vmul.f32 -0.00019511016, %v514_v18  ;;  %v371_v56 = vmul.f32 %v211_v50, %v211_v50  ;;  %v373_v57 = vmul.f32 %v366_v52, %v366_v52 }
  0x6f   :  { %v376_v3 = vmul.f32 %v366_v52, %v211_v50 }
  0x70   :  { %v516_v59 = vadd.f32 0.041655596, %v515_v26  ;;  %v523_v30 = vadd.f32 0.008332121, %v522_v16  ;;  %v372_v42 = vmul.f32 %v371_v56, %v368_v10  ;;  %v374_v6 = vmul.f32 %v373_v57, %v370_v31 }
  0x71   :  { %v379_v51 = vmul.f32 %v373_v57, %v368_v10  ;;  %v380_v13 = vmul.f32 %v371_v56, %v370_v31  ;;  %v1226_v17 = vmul.f32 %v377_v5, %v376_v3 }
  0x72   :  { %v517_v45 = vmul.f32 %v516_v59, %v514_v18  ;;  %v524_v37 = vmul.f32 %v523_v30, %v514_v18  ;;  %v1228_v34 = vadd.f32 %v374_v6, %v372_v42 }
  0x73   :  { %v1230_v26 = vadd.f32 %v380_v13, %v379_v51 }
  0x74   :  { %v518_v38 = vadd.f32 -0.4999988, %v517_v45  ;;  %v525_v46 = vadd.f32 -0.16666654, %v524_v37  ;;  %v726_v45 = vmul.f32 %v1226_v17, %v1226_v17 }
  0x75   :  { %v725_v23 = vmul.f32 %v1230_v26, %v1228_v34 }
  0x76   :  { %v519_v29 = vmul.f32 %v518_v38, %v514_v18  ;;  %v526_v49 = vmul.f32 %v525_v46, %v514_v18 }
  0x77   :  { %v727_v2 = vsub.f32 %v725_v23, %v726_v45 }
  0x78   :  { %v520_v21 = vadd.f32 1.0, %v519_v29  ;;  %v527_v0 = vadd.f32 1.0, %v526_v49 }
  0x79   :  { %v1239_v9 = vmax.f32 %v727_v2, 1e-07 }
  0x7a   :  { %v528_v40 = vmul.f32 %v527_v0, %v512_v15  ;;  %v536_v58 = vxor.u32 2147483648, %v520_v21 }
  0x7b   :  { %vm739_vm14 = vcmp.eq.f32.partialorder %v1239_v9, inf  ;;  %vm741_vm0 = vcmp.eq.f32.partialorder %v1239_v9, 0.0 }
  0x7c   :  { %v533_v20 = vxor.u32 2147483648, %v528_v40  ;;  %v537_v60 = vsel %vm535_vm4, %v536_v58, %v528_v40  ;;  %v692_v63 = vsel %vm690_vm5, %v536_v58, %v528_v40 }
  0x7e   :  { %v534_v41 = vsel %vm532_vm6, %v520_v21, %v533_v20  ;;  %v689_v7 = vsel %vm687_vm7, %v520_v21, %v533_v20 }
  0x7f   :  { %v538_v8 = vsel %vm531_vm3, %v534_v41, %v537_v60  ;;  %v693_v11 = vsel %vm686_vm8, %v689_v7, %v692_v63 }
  0x80   :  { %v539_v14 = vsel %vm529_vm9, nan, %v538_v8  ;;  %v694_v15 = vsel %vm529_vm9, nan, %v693_v11 }
  0x81   :  { %v699_v18 = vmul.f32 %v539_v14, %v539_v14  ;;  %v701_v19 = vmul.f32 %v694_v15, %v694_v15  ;;  %v704_v4 = vmul.f32 %v694_v15, %v539_v14 }
  0x83   :  { %v700_v1 = vmul.f32 %v699_v18, %v696_v61  ;;  %v702_v22 = vmul.f32 %v701_v19, %v698_v62  ;;  %v706_v24 = vmul.f32 %v705_v12, %v704_v4  ;;  %v707_v25 = vmul.f32 %v701_v19, %v696_v61 }
  0x84   :  { %v708_v16 = vmul.f32 %v699_v18, %v698_v62 }
  0x85   :  { %v703_v28 = vadd.f32 %v702_v22, %v700_v1  ;;  %v760_v54 = vadd.f32 %v706_v24, %v1226_v17  ;;  %v729_v39 = vmul.f32 %v706_v24, %v706_v24 }
  0x86   :  { %v709_v59 = vadd.f32 %v708_v16, %v707_v25 }
  0x87   :  { %v759_v30 = vadd.f32 %v703_v28, %v1228_v34  ;;  %v763_v35 = vmul.f32 %v760_v54, %v760_v54  ;;  %v780_v52 = vsub.f32 0.0, %v760_v54 }
  0x88   :  { %v761_v32 = vadd.f32 %v709_v59, %v1230_v26  ;;  %v728_v37 = vmul.f32 %v709_v59, %v703_v28 }
  0x8a   :  { %v762_v36 = vmul.f32 %v761_v32, %v759_v30  ;;  %v730_v43 = vsub.f32 %v728_v37, %v729_v39 }
  0x8c   :  { %v764_v27 = vsub.f32 %v762_v36, %v763_v35  ;;  %v1241_v48 = vmax.f32 %v730_v43, 1e-07 }
  0x8e   :  { %920 = vrcp.f32 %v764_v27  ;;  %v776_v38 = vand.u32 2147483648, %v764_v27  ;;  %vm770_vm10 = vweird.f32 %v764_v27  ;;  %v774_v47 = vand.u32 2147483647, %v764_v27 }
  0x8f   :  { %922 = vrsqrt.f32 %v1239_v9  ;;  %vm753_vm15 = vcmp.eq.f32.partialorder %v1241_v48, inf  ;;  %v756_v39 = vand.u32 2147483648, %v1241_v48  ;;  %vm755_vm1 = vcmp.eq.f32.partialorder %v1241_v48, 0.0 }
  0x90   :  { %v777_v49 = vor.u32 1.1754944e-38, %v776_v38  ;;  %vm775_vm13 = vcmp.eq.f32.partialorder %v774_v47, 8.507059e+37  ;;  %924 = vrsqrt.f32 %v1241_v48 }
  0x94   :  { %v921_v33 = vpop.eup %920 }
  0x95   :  { %v766_v44 = vmul.f32 %v921_v33, %v764_v27  ;;  %vm771_vm11 = vweird.f32 %v921_v33  ;;  %v923_v40 = vpop.eup %922 }
  0x96   :  { %vm772_vm12 = vmor %vm770_vm10, %vm771_vm11  ;;  %v925_v20 = vpop.eup %924  ;;  %v733_v42 = vmul.f32 %v923_v40, %v1239_v9 }
  0x97   :  { %v767_v46 = vsub.f32 1.0, %v766_v44  ;;  %v747_v8 = vmul.f32 %v925_v20, %v1241_v48 }
  0x98   :  { %v734_v19 = vmul.f32 %v923_v40, %v733_v42 }
  0x99   :  { %v768_v29 = vmul.f32 %v921_v33, %v767_v46  ;;  %v748_v4 = vmul.f32 %v925_v20, %v747_v8 }
  0x9a   :  { %v735_v28 = vmul.f32 0.5, %v734_v19 }
  0x9b   :  { %v769_v50 = vadd.f32 %v921_v33, %v768_v29  ;;  %v749_v54 = vmul.f32 0.5, %v748_v4 }
  0x9d   :  { %v773_v53 = vsel %vm772_vm12, %v921_v33, %v769_v50  ;;  %v750_v35 = vsub.f32 1.5, %v749_v54 }
  0x9e   :  { %v778_v55 = vsel %vm775_vm13, %v777_v49, %v773_v53  ;;  %v44_v53 = vld [vmem:[#allocation2] sm:$0xff] }
  0x9f   :  { %v779_v10 = vmul.f32 %v778_v55, %v761_v32  ;;  %v781_v21 = vmul.f32 %v780_v52, %v778_v55  ;;  %v782_v0 = vmul.f32 %v778_v55, %v759_v30  ;;  %v736_v32 = vsub.f32 1.5, %v735_v28 }
  0xa0   :  { %v751_v27 = vmul.f32 %v925_v20, %v750_v35 }
  0xa1   :  { %v783_v31 = vmul.f32 %v779_v10, %v1228_v34  ;;  %v784_v56 = vmul.f32 %v781_v21, %v1226_v17  ;;  %v786_v57 = vmul.f32 %v781_v21, %v1228_v34  ;;  %v787_v58 = vmul.f32 %v782_v0, %v1226_v17 }
  0xa2   :  { %v789_v61 = vmul.f32 %v779_v10, %v1226_v17  ;;  %v790_v62 = vmul.f32 %v781_v21, %v1230_v26  ;;  %v792_v63 = vmul.f32 %v782_v0, %v1230_v26  ;;  %v737_v36 = vmul.f32 %v923_v40, %v736_v32  ;;  %v45_v10 = vld [vmem:[#allocation2 + $0x8] sm:$0xff] }
  0xa3   :  { %v785_v60 = vadd.f32 %v784_v56, %v783_v31  ;;  %v788_v3 = vadd.f32 %v787_v58, %v786_v57  ;;  %v49_v21 = vld [vmem:[#allocation5] sm:$0xff] }
  0xa4   :  { %v791_v5 = vadd.f32 %v790_v62, %v789_v61  ;;  %v793_v6 = vadd.f32 %v792_v63, %v784_v56  ;;  %v738_v45 = vmul.f32 %v737_v36, %v1239_v9 }
  0xa5   :  { %v794_v41 = vmul.f32 %v785_v60, %v1228_v34  ;;  %v798_v7 = vmul.f32 %v785_v60, %v1226_v17  ;;  %v795_v11 = vmul.f32 %v788_v3, %v1226_v17  ;;  %v799_v12 = vmul.f32 %v788_v3, %v1230_v26 }
  0xa6   :  { %v802_v51 = vmul.f32 %v791_v5, %v1226_v17  ;;  %v803_v13 = vmul.f32 %v793_v6, %v1230_v26  ;;  %v740_v33 = vsel %vm739_vm14, %v1239_v9, %v738_v45 }
  0xa7   :  { %v796_v14 = vadd.f32 %v795_v11, %v794_v41  ;;  %v800_v15 = vadd.f32 %v799_v12, %v798_v7 }
  0xa8   :  { %v804_v18 = vadd.f32 %v803_v13, %v802_v51 }
  0xa9   :  { %v797_v1 = vsub.f32 %v1228_v34, %v796_v14  ;;  %v801_v22 = vsub.f32 %v1226_v17, %v800_v15  ;;  %v752_v34 = vmul.f32 %v751_v27, %v1241_v48 }
  0xaa   :  { %v805_v24 = vsub.f32 %v1230_v26, %v804_v18  ;;  %v742_v26 = vand.u32 2147483648, %v1239_v9  ;;  %v50_v9 = vld [vmem:[#allocation5 + $0x8] sm:$0xff] }
  0xab   :  { %v807_v25 = vmul.f32 %v801_v22, %v801_v22  ;;  %v754_v2 = vsel %vm753_vm15, %v1241_v48, %v752_v34  ;;  %v710_v48 = vsub.f32 %v44_v53, %v49_v21  ;;  %v717_v57 = vsub.f32 %v45_v10, %v50_v9 }
  0xac   :  { %v806_v16 = vmul.f32 %v805_v24, %v797_v1  ;;  %v743_v38 = vsel %vm741_vm0, %v742_v26, %v740_v33  ;;  %v757_v46 = vsel %vm755_vm1, %v756_v39, %v754_v2 }
  0xad   :  { %v744_v49 = vmul.f32 4.0, %v743_v38  ;;  %v758_v50 = vmul.f32 4.0, %v757_v46  ;;  %v711_v61 = vand.u32 2147483647, %v710_v48  ;;  %v718_v62 = vand.u32 2147483647, %v717_v57 }
  0xae   :  { %v808_v59 = vsub.f32 %v806_v16, %v807_v25 }
  0xaf   :  { %v825_v56 = vadd.f32 %v758_v50, %v744_v49  ;;  %v713_v60 = vmul.f32 %v711_v61, %v711_v61  ;;  %v720_v63 = vmul.f32 %v718_v62, %v718_v62  ;;  %v906_v42 = vadd.f32 -0.055555556, %v711_v61 }
  0xb0   :  { %v809_v30 = vmax.f32 %v808_v59, 1e-07  ;;  %v907_v41 = vadd.f32 -0.055555556, %v718_v62  ;;  %vm712_vm5 = vcmp.lt.f32.partialorder %v711_v61, 0.11111111 }
  0xb1   :  { %v714_v5 = vmul.f32 4.5, %v713_v60  ;;  %v721_v6 = vmul.f32 4.5, %v720_v63  ;;  %vm719_vm6 = vcmp.lt.f32.partialorder %v718_v62, 0.11111111 }
  0xb2   :  { %926 = vrsqrt.f32 %v809_v30  ;;  %vm817_vm2 = vcmp.eq.f32.partialorder %v809_v30, inf  ;;  %v820_v29 = vand.u32 2147483648, %v809_v30  ;;  %vm819_vm3 = vcmp.eq.f32.partialorder %v809_v30, 0.0 }
  0xb3   :  { %v716_v51 = vsel %vm712_vm5, %v714_v5, %v906_v42  ;;  %v723_v13 = vsel %vm719_vm6, %v721_v6, %v907_v41 }
  0xb4   :  { %v724_v18 = vadd.f32 %v723_v13, %v716_v51 }
  0xb6   :  { %v844_v24 = vmul.f32 0.01, %v724_v18 }
  0xb8   :  { %v927_v23 = vpop.eup %926 }
  0xb9   :  { %v811_v37 = vmul.f32 %v927_v23, %v809_v30 }
  0xbb   :  { %v812_v17 = vmul.f32 %v927_v23, %v811_v37 }
  0xbd   :  { %v813_v43 = vmul.f32 0.5, %v812_v17 }
  0xbf   :  { %v814_v44 = vsub.f32 1.5, %v813_v43 }
  0xc1   :  { %v815_v47 = vmul.f32 %v927_v23, %v814_v44 }
  0xc3   :  { %v816_v52 = vmul.f32 %v815_v47, %v809_v30 }
  0xc5   :  { %v818_v55 = vsel %vm817_vm2, %v809_v30, %v816_v52 }
  0xc6   :  { %v821_v0 = vsel %vm819_vm3, %v820_v29, %v818_v55 }
  0xc7   :  { %v822_v31 = vmul.f32 4.0, %v821_v0 }
  0xc9   :  { %vm823_vm4 = vcmp.ne.f32.partialorder %v822_v31, %v822_v31 }
  0xca   :  { %v824_v40 = vsel %vm823_vm4, 0.0, %v822_v31 }
  0xcb   :  { %v826_v58 = vsub.f32 %v825_v56, %v824_v40 }
  0xcd   :  { %v827_v20 = vadd.f32 1e-06, %v826_v58 }
  0xcf   :  { %928 = vrcp.f32 %v827_v20  ;;  %v839_v8 = vand.u32 2147483648, %v827_v20  ;;  %vm833_vm7 = vweird.f32 %v827_v20  ;;  %v837_v12 = vand.u32 2147483647, %v827_v20 }
  0xd1   :  { %v840_v15 = vor.u32 1.1754944e-38, %v839_v8  ;;  %vm838_vm10 = vcmp.eq.f32.partialorder %v837_v12, 8.507059e+37 }
  0xd5   :  { %v929_v3 = vpop.eup %928 }
  0xd6   :  { %v829_v7 = vmul.f32 %v929_v3, %v827_v20  ;;  %vm834_vm8 = vweird.f32 %v929_v3 }
  0xd7   :  { %vm835_vm9 = vmor %vm833_vm7, %vm834_vm8 }
  0xd8   :  { %v830_v11 = vsub.f32 1.0, %v829_v7 }
  0xda   :  { %v831_v14 = vmul.f32 %v929_v3, %v830_v11 }
  0xdc   :  { %v832_v19 = vadd.f32 %v929_v3, %v831_v14 }
  0xde   :  { %v836_v4 = vsel %vm835_vm9, %v929_v3, %v832_v19 }
  0xdf   :  { %v841_v1 = vsel %vm838_vm10, %v840_v15, %v836_v4 }
  0xe0   :  { %v842_v22 = vmul.f32 %v841_v1, %v824_v40 }
  0xe2   :  { %v843_v25 = vsub.f32 1.0, %v842_v22 }
  0xe4   :  { %v845_v16 = vadd.f32 %v844_v24, %v843_v25 }
  0xe6   :  { %v846_v28 = vmax.f32 %v845_v16, 1e-07 }
  0xe8   :  { %847 = vst [vmem:[#allocation7] sm:$0xff] %v846_v28  ;;  %v848_v54 = vadd.f32 1.0, %v846_v28  ;;  %v851_v59 = vmul.f32 -0.5, %v846_v28  ;;  %v854_v32 = vand.u32 2147483647, %v846_v28 }
  0xea   :  { %930 = vlog2.f32 %v848_v54  ;;  %v852_v30 = vadd.f32 1.0, %v851_v59  ;;  %vm855_vm11 = vcmp.lt.f32.partialorder %v854_v32, 0.0004427343 }
  0xec   :  { %v853_v35 = vmul.f32 %v852_v30, %v846_v28 }
  0xf0   :  { %v931_v36 = vpop.eup %930 }
  0xf1   :  { %v850_v27 = vmul.f32 0.6931472, %v931_v36 }
  0xf3   :  { %v856_v23 = vsel %vm855_vm11, %v853_v35, %v850_v27 }
  0xf4   :  { %v857_v45 = vadd.f32 1.0, %v856_v23 }
  0xf6   :  { %932 = vrcp.f32 %v857_v45  ;;  %v869_v17 = vand.u32 2147483648, %v857_v45  ;;  %vm863_vm12 = vweird.f32 %v857_v45  ;;  %v867_v39 = vand.u32 2147483647, %v857_v45 }
  0xf8   :  { %v870_v2 = vor.u32 1.1754944e-38, %v869_v17  ;;  %vm868_vm15 = vcmp.eq.f32.partialorder %v867_v39, 8.507059e+37 }
  0xfc   :  { %v933_v34 = vpop.eup %932 }
  0xfd   :  { %v859_v37 = vmul.f32 %v933_v34, %v857_v45  ;;  %vm864_vm13 = vweird.f32 %v933_v34 }
  0xfe   :  { %vm865_vm14 = vmor %vm863_vm12, %vm864_vm13 }
  0xff   :  { %v860_v26 = vsub.f32 1.0, %v859_v37 }
 0x101   :  { %v861_v33 = vmul.f32 %v933_v34, %v860_v26 }
 0x103   :  { %v862_v43 = vadd.f32 %v933_v34, %v861_v33 }
 0x105   :  { %v866_v44 = vsel %vm865_vm14, %v933_v34, %v862_v43 }
 0x106   :  { %v871_v38 = vsel %vm868_vm15, %v870_v2, %v866_v44 }
 0x107   :  { %873 = vst [vmem:[#allocation7 + $0x8] sm:$0xff] %v871_v38 }
 0x108   :  { %886 = dma.vmem_to_hbm [thread:$0]  %s879_s1, 256, %s881_s23, [#allocation4], %s1013_s17, %s1013_s17, %s1014_s18  }
 0x109   :  { %1010 = dma.done.wait [#allocation4], 256  }
 0x10a   :  { %1011 = vsyncadd [#allocation4], 4294967040 }
 0x10b   :  { %891 = vsyncpa [#allocation3], 1 }
 0x10c   :  { %892 = vsyncpa [#allocation6], 1 }
 0x10d   :  { %893 = vsyncpa [#allocation4], 1 }

</bundles_post_ra>
